<compile_context>
chip_gen: v6e
topology: v6e:2x2x1
jax: 0.10.0
libtpu: 0.0.40
codegen_flags: <defaults>
</compile_context>

<pallas_src>
import functools

import numpy as np
import jax
import jax.numpy as jnp
from jax.experimental import pallas as pl
from jax.experimental.pallas import tpu as pltpu


# ----------------------------------------------------------------------------
# Deterministic parameter construction (faithful re-implementation of
# torch_harmonics' quadrature / legendre precompute for the inverse SHT).
# ----------------------------------------------------------------------------
def _clenshaw_curtiss_nodes(n):
    # "equiangular" grid in torch_harmonics: theta_j = pi * j / (n - 1), nodes = cos(theta_j)
    tj = np.pi * np.arange(0, n) / (n - 1)
    return np.cos(tj)


def _legpoly(mmax, lmax, x, norm="backward", inverse=True, csphase=True):
    # values of (-1)^m c^l_m P^l_m(x); shape (mmax, lmax, len(x))
    nmax = max(mmax, lmax)
    vdm = np.zeros((nmax, nmax, len(x)), dtype=np.float64)

    norm_factor = 1.0 if norm == "ortho" else np.sqrt(4.0 * np.pi)
    norm_factor = 1.0 / norm_factor if inverse else norm_factor

    vdm[0, 0, :] = norm_factor / np.sqrt(4.0 * np.pi)

    for l in range(1, nmax):
        vdm[l - 1, l, :] = np.sqrt(2 * l + 1) * x * vdm[l - 1, l - 1, :]
        vdm[l, l, :] = np.sqrt((2 * l + 1) * (1 + x) * (1 - x) / 2 / l) * vdm[l - 1, l - 1, :]

    for l in range(2, nmax):
        for m in range(0, l - 1):
            vdm[m, l, :] = (
                x * np.sqrt((2 * l - 1) / (l - m) * (2 * l + 1) / (l + m)) * vdm[m, l - 1, :]
                - np.sqrt((l + m - 1) / (l - m) * (2 * l + 1) / (2 * l - 3) * (l - m - 1) / (l + m))
                * vdm[m, l - 2, :]
            )

    if norm == "schmidt":
        for l in range(0, nmax):
            if inverse:
                vdm[:, l, :] *= np.sqrt(2 * l + 1)
            else:
                vdm[:, l, :] /= np.sqrt(2 * l + 1)

    vdm = vdm[:mmax, :lmax]

    if csphase:
        for m in range(1, mmax, 2):
            vdm[m] *= -1.0

    return vdm


def _round_up(x, mult):
    return ((x + mult - 1) // mult) * mult


def _default_vmem_budget():
    """Per-core VMEM budget with ~15% headroom; falls back to 64 MiB (v7x physical)."""
    try:
        cap = int(pltpu.get_tpu_info().vmem_capacity_bytes)
        if cap <= 0:
            raise ValueError("bad vmem capacity")
    except Exception:
        cap = 64 << 20
    return int(cap * 85 // 100)


# ----------------------------------------------------------------------------
# Fused Pallas kernel: blocked Legendre synthesis (l-reduction, triangle-skipped)
# + Fourier synthesis, accumulated into a VMEM-resident output per latitude tile.
# Grid: (k_tiles [parallel], m_blocks [arbitrary], l_blocks [arbitrary]).
# ----------------------------------------------------------------------------
def _grf_fused_kernel(x_ref, p_ref, fct_ref, fst_ref, o_ref, a_ref, *, n_batch, n_lblocks):
    """Block shapes:
      x_ref   : (TM, 2N, TL)      noise, rows [0,N) real, [N,2N) imag, m-major
      p_ref   : (TM, TL, TK)      sqrt_eig-folded Legendre synthesis table (zero-padded)
      fct_ref : (NLON_P, TM)      w_m * cos(2*pi*m*j/nlon), transposed
      fst_ref : (NLON_P, TM)      -w_m * sin(2*pi*m*j/nlon), transposed (sign pre-folded)
      o_ref   : (N, NLON_P, TK)   resident f32 accumulator = u transposed in its last two dims
      a_ref   : (TM, 2N, TK)      f32 Legendre accumulator scratch (reduced over l-blocks)
    """
    mb = pl.program_id(1)
    lb = pl.program_id(2)

    @pl.when(jnp.logical_and(mb == 0, lb == 0))
    def _init_out():
        o_ref[...] = jnp.zeros_like(o_ref)

    @pl.when(lb == 0)
    def _init_acc():
        a_ref[...] = jnp.zeros_like(a_ref)

    # (1) Legendre synthesis for this (m-block, l-block) on the MXU.
    #     The l < m triangle is identically zero (tril sqrt_eig folded in), so skip it.
    @pl.when(lb >= mb)
    def _legendre():
        a_ref[...] = a_ref[...] + jnp.einsum(
            "mnl,mlk->mnk", x_ref[...], p_ref[...], preferred_element_type=jnp.float32
        )

    # (2) Fourier synthesis, once per m-block, accumulated into the resident output:
    #     u^T[n, j, k] += fcos^T @ a_re[n]  +  (-fsin)^T @ a_im[n]
    @pl.when(lb == n_lblocks - 1)
    def _fourier():
        fct = fct_ref[...]
        fst = fst_ref[...]
        a = a_ref[...].astype(fct.dtype)
        for n in range(n_batch):  # unrolled; N is small, each dot has K = TM (>=128)
            o_ref[n] = (
                o_ref[n]
                + jnp.dot(fct, a[:, n, :], preferred_element_type=jnp.float32)
                + jnp.dot(fst, a[:, n_batch + n, :], preferred_element_type=jnp.float32)
            )


@functools.partial(
    jax.jit, static_argnames=("tm", "nlat", "nlon", "out_dtype", "vmem_budget")
)
def _grf_isht_forward(xr, xim, p_pad, fct_pad, fst_pad, *, tm, nlat, nlon,
                      out_dtype, vmem_budget):
    """xr, xim: (N, lmax, mmax) real/imag noise; returns u: (N, nlat, nlon)."""
    n_batch, lmax, _ = xr.shape
    mp, lp, kp = p_pad.shape
    nlon_p = fct_pad.shape[0]
    comp_dtype = p_pad.dtype
    comp_size = np.dtype(comp_dtype).itemsize
    tl = tm
    n_mb = mp // tm
    n_lb = lp // tl

    # m-major noise, real/imag stacked along rows: (MP, 2N, LP). The Nyquist column
    # m = nlat is dropped: tril(sqrt_eig) makes it identically zero.
    xs = jnp.concatenate(
        [jnp.transpose(xr[:, :, :nlat], (2, 0, 1)),
         jnp.transpose(xim[:, :, :nlat], (2, 0, 1))],
        axis=1,
    ).astype(comp_dtype)
    xs = jnp.pad(xs, ((0, mp - nlat), (0, 0), (0, lp - lmax)))

    # ---- latitude tile (TK) + VMEM plan ------------------------------------
    def footprint(tk):
        return (
            2 * tm * 2 * n_batch * tl * comp_size   # x block, double buffered
            + 2 * tm * tl * tk * comp_size          # p block, double buffered
            + 2 * 2 * nlon_p * tm * comp_size       # fct + fst blocks, double buffered
            + 2 * n_batch * nlon_p * tk * 4         # resident f32 output (+ writeback buffer)
            + tm * 2 * n_batch * tk * 4             # f32 Legendre accumulator scratch
        )

    # Prefer >=2 latitude tiles so the parallel axis can feed a second TensorCore (v7x).
    tk_opts = [c for c in (256, 128) if kp % c == 0 and kp // c >= 2] or [kp]
    tk = tk_opts[-1]
    for c in tk_opts:
        if footprint(c) + (4 << 20) <= vmem_budget:
            tk = c
            break
    n_kt = kp // tk

    vmem_limit = int(min(vmem_budget, max(footprint(tk) + (8 << 20), 32 << 20)))

    u_t = pl.pallas_call(
        functools.partial(_grf_fused_kernel, n_batch=n_batch, n_lblocks=n_lb),
        out_shape=jax.ShapeDtypeStruct((n_batch, nlon_p, kp), jnp.float32),
        grid=(n_kt, n_mb, n_lb),
        in_specs=[
            # noise: l-block index clamped to the first nonzero block (DMA elided for l < m)
            pl.BlockSpec((tm, 2 * n_batch, tl),
                         lambda kt, mb, lb: (mb, 0, jnp.maximum(lb, mb))),
            # folded Legendre table, dominant HBM stream; zero l < m triangle never re-fetched
            pl.BlockSpec((tm, tl, tk),
                         lambda kt, mb, lb: (mb, jnp.maximum(lb, mb), kt)),
            pl.BlockSpec((nlon_p, tm), lambda kt, mb, lb: (0, mb)),
            pl.BlockSpec((nlon_p, tm), lambda kt, mb, lb: (0, mb)),
        ],
        out_specs=pl.BlockSpec((n_batch, nlon_p, tk), lambda kt, mb, lb: (0, 0, kt)),
        scratch_shapes=[pltpu.VMEM((tm, 2 * n_batch, tk), jnp.float32)],
        compiler_params=pltpu.CompilerParams(
            dimension_semantics=("parallel", "arbitrary", "arbitrary"),
            vmem_limit_bytes=vmem_limit,
        ),
    )(xs, p_pad, fct_pad, fst_pad)

    # (N, nlon_p, kp) -> slice valid region first, then one small transpose to (N, nlat, nlon).
    u = jnp.transpose(u_t[:, :nlon, :nlat], (0, 2, 1))
    return u.astype(out_dtype)


# ----------------------------------------------------------------------------
# Module-equivalent wrapper
# ----------------------------------------------------------------------------
class GaussianRandomFieldS2:
    def __init__(self, nlat, alpha=2.0, tau=3.0, sigma=None, radius=1.0,
                 grid="equiangular", dtype=jnp.float32, compute_dtype=None):
        self.nlat = nlat
        self.nlon = 2 * nlat
        self.lmax = nlat
        self.mmax = nlat + 1
        self.dtype = dtype
        # dtype of the big streamed tables / MXU inputs. Default bfloat16 (halves the dominant
        # HBM stream, native MXU dtype); accumulation is always f32. Expect ~1e-2 relative
        # error vs an f32 reference -- statistically irrelevant for a GRF sampler.
        self.compute_dtype = jnp.bfloat16 if compute_dtype is None else compute_dtype

        if sigma is None:
            assert alpha > 1.0, f"Alpha must be greater than one, got {alpha}."
            sigma = tau ** (0.5 * (2 * alpha - 2.0))

        # sqrt_eig: (nlat, nlat+1), lower-triangular, [0,0] = 0
        j = np.arange(nlat, dtype=np.float64)
        eig = np.tile((j * (j + 1)).reshape(nlat, 1), (1, nlat + 1))
        sqrt_eig = sigma * (eig / radius ** 2 + tau ** 2) ** (-alpha / 2.0)
        sqrt_eig = np.tril(sqrt_eig)
        sqrt_eig[0, 0] = 0.0

        # Legendre synthesis table pct: (mmax, lmax, nlat), norm='backward', inverse
        if grid == "equiangular":
            cost = _clenshaw_curtiss_nodes(nlat)
        elif grid == "legendre-gauss":
            cost, _ = np.polynomial.legendre.leggauss(nlat)
        else:
            raise ValueError(f"Unknown grid {grid}")
        t = np.flip(np.arccos(cost))
        pct = _legpoly(self.mmax, self.lmax, np.cos(t), norm="backward",
                       inverse=True, csphase=True)

        # inverse real FFT (norm="forward") synthesis matrices; DC/Nyquist weight 1, rest 2
        m = np.arange(self.mmax, dtype=np.float64).reshape(-1, 1)
        jj = np.arange(self.nlon, dtype=np.float64).reshape(1, -1)
        ang = 2.0 * np.pi * m * jj / self.nlon
        w = np.full((self.mmax, 1), 2.0)
        w[0, 0] = 1.0
        w[-1, 0] = 1.0
        fcos = w * np.cos(ang)          # (mmax, nlon)
        fsin = w * np.sin(ang)          # (mmax, nlon)

        # unpadded copies, used by the pure-JAX reference / inspection
        self.sqrt_eig = jnp.asarray(sqrt_eig, dtype=jnp.float32)
        self.pct = jnp.asarray(np.ascontiguousarray(pct), dtype=jnp.float32)
        self.fcos = jnp.asarray(fcos, dtype=jnp.float32)
        self.fsin = jnp.asarray(fsin, dtype=jnp.float32)

        # -------- padded / folded kernel parameters --------
        # Effective m range: [0, nlat). The Nyquist mode m = nlat multiplies a zero column of
        # tril(sqrt_eig), so it is dropped (no padded-m waste for 128-divisible nlat).
        self.m_eff = nlat
        if self.m_eff >= 128:
            self.tm = 128                              # full MXU contraction depth for stage 2
        else:
            self.tm = _round_up(self.m_eff, 8)         # small problems: one full m block
        self.mp = _round_up(self.m_eff, self.tm)
        self.tl = self.tm                              # l blocked with the same size as m
        self.lp = _round_up(self.lmax, self.tl)
        self.kp = _round_up(self.nlat, 128)            # lane dim of Legendre table & output
        self.nlon_p = _round_up(self.nlon, 8)          # sublane dim of the output

        # sqrt_eig folded into the Legendre table; zero-padded to (MP, LP, KP)
        pct_scaled = pct[: self.m_eff] * sqrt_eig.T[: self.m_eff, :, None]  # (m_eff, lmax, nlat)
        p_pad = np.zeros((self.mp, self.lp, self.kp), dtype=np.float32)
        p_pad[: self.m_eff, : self.lmax, : self.nlat] = pct_scaled
        self.p_pad = jnp.asarray(p_pad, dtype=self.compute_dtype)

        # pre-transposed Fourier synthesis matrices (sin already negated), zero-padded
        fct = np.zeros((self.nlon_p, self.mp), dtype=np.float32)
        fst = np.zeros((self.nlon_p, self.mp), dtype=np.float32)
        fct[: self.nlon, : self.m_eff] = fcos[: self.m_eff].T
        fst[: self.nlon, : self.m_eff] = -fsin[: self.m_eff].T
        self.fct_pad = jnp.asarray(fct, dtype=self.compute_dtype)
        self.fst_pad = jnp.asarray(fst, dtype=self.compute_dtype)

        # per-core VMEM budget (never exceeds physical; v7x-safe)
        self.vmem_budget = _default_vmem_budget()

    def __call__(self, N, xi=None, key=None):
        if xi is None:
            key = jax.random.PRNGKey(0) if key is None else key
            noise = jax.random.normal(key, (N, self.nlat, self.mmax, 2), dtype=self.dtype)
            xr, xim = noise[..., 0], noise[..., 1]
        else:
            xr = jnp.real(xi).astype(self.dtype)
            xim = jnp.imag(xi).astype(self.dtype)
        return _grf_isht_forward(
            xr, xim, self.p_pad, self.fct_pad, self.fst_pad,
            tm=self.tm, nlat=self.nlat, nlon=self.nlon,
            out_dtype=self.dtype, vmem_budget=self.vmem_budget)


# pure-JAX reference for correctness checking
def grf_isht_reference(xr, xim, sqrt_eig, pct, fcos, fsin):
    cr = xr * sqrt_eig[None]
    ci = xim * sqrt_eig[None]
    ar = jnp.einsum("nlm,mlk->nkm", cr, pct)
    ai = jnp.einsum("nlm,mlk->nkm", ci, pct)
    return jnp.einsum("nkm,mj->nkj", ar, fcos) - jnp.einsum("nkm,mj->nkj", ai, fsin)


if __name__ == "__main__":
    nlat = 8
    N = 2

    key = jax.random.PRNGKey(0)
    noise = jax.random.normal(key, (N, nlat, nlat + 1, 2), dtype=jnp.float32)
    xr, xim = noise[..., 0], noise[..., 1]
    xi = xr + 1j * xim                     # complex noise, shape (N, nlat, nlat+1)

    # strict check with f32 tables
    grf32 = GaussianRandomFieldS2(nlat, alpha=2.0, tau=3.0, compute_dtype=jnp.float32)
    u = jax.block_until_ready(grf32(N, xi=xi))
    assert u.shape == (N, nlat, 2 * nlat), u.shape
    assert u.dtype == jnp.float32

    u_ref = grf_isht_reference(xr, xim, grf32.sqrt_eig, grf32.pct, grf32.fcos, grf32.fsin)
    assert jnp.allclose(u, u_ref, rtol=1e-4, atol=1e-4), float(jnp.max(jnp.abs(u - u_ref)))

    # default configuration (bf16 streamed tables, f32 accumulation): loose tolerance
    grf = GaussianRandomFieldS2(nlat, alpha=2.0, tau=3.0)
    ub = jax.block_until_ready(grf(N, xi=xi))
    assert ub.shape == (N, nlat, 2 * nlat)
    scale = float(jnp.max(jnp.abs(u_ref))) + 1e-12
    err = float(jnp.max(jnp.abs(ub - u_ref)))
    assert err <= 3e-2 * scale + 1e-3, (err, scale)

    # also exercise the internal Gaussian-noise sampling path
    u2 = jax.block_until_ready(grf(3, key=jax.random.PRNGKey(1)))
    assert u2.shape == (3, nlat, 2 * nlat)

    print("KERNEL_OK")
</pallas_src>

<mosaic_0001>
module attributes {stable_mosaic.version = 11 : i64} {
  func.func @_grf_fused_kernel(%arg0: i32, %arg1: i32, %arg2: i32, %arg3: memref<8x4x8xf32, #tpu.memory_space<vmem>>, %arg4: memref<8x8x128xf32, #tpu.memory_space<vmem>>, %arg5: memref<16x8xf32, #tpu.memory_space<vmem>>, %arg6: memref<16x8xf32, #tpu.memory_space<vmem>>, %arg7: memref<2x16x128xf32, #tpu.memory_space<vmem>>, %arg8: memref<8x4x128xf32, #tpu.memory_space<vmem>>) attributes {dimension_semantics = [#tpu.dimension_semantics<parallel>, #tpu.dimension_semantics<arbitrary>, #tpu.dimension_semantics<arbitrary>], iteration_bounds = array<i64: 1, 1, 1>, scalar_prefetch = 0 : i64, scratch_operands = 1 : i64, tpu.core_type = #tpu.core_type<tc>, window_params = [{transform_indices = @transform_0, window_bounds = array<i64: 8, 4, 8>}, {transform_indices = @transform_1, window_bounds = array<i64: 8, 8, 128>}, {transform_indices = @transform_2, window_bounds = array<i64: 16, 8>}, {transform_indices = @transform_3, window_bounds = array<i64: 16, 8>}, {transform_indices = @transform_4, window_bounds = array<i64: 2, 16, 128>}]} {
    %c0_i32 = arith.constant 0 : i32
    %0 = arith.cmpi eq, %arg1, %c0_i32 : i32
    %c0_i32_0 = arith.constant 0 : i32
    %1 = arith.cmpi eq, %arg2, %c0_i32_0 : i32
    %2 = arith.andi %0, %1 : i1
    %3 = arith.extui %2 : i1 to i32
    %c0_i32_1 = arith.constant 0 : i32
    %4 = arith.cmpi ne, %3, %c0_i32_1 : i32
    scf.if %4 {
      %cst = arith.constant 0.000000e+00 : f32
      %14 = vector.broadcast %cst : f32 to vector<2x16x128xf32>
      %c0 = arith.constant 0 : index
      %c0_7 = arith.constant 0 : index
      %c0_8 = arith.constant 0 : index
      %15 = vector.load %arg7[%c0, %c0_7, %c0_8] : memref<2x16x128xf32, #tpu.memory_space<vmem>>, vector<2x16x128xf32>
      tpu.vector_store %arg7[%c0, %c0_7, %c0_8], %14 {strides = array<i32>} : memref<2x16x128xf32, #tpu.memory_space<vmem>>, vector<2x16x128xf32>,
    } else {
    }
    %c0_i32_2 = arith.constant 0 : i32
    %5 = arith.cmpi eq, %arg2, %c0_i32_2 : i32
    %6 = arith.extui %5 : i1 to i32
    %c0_i32_3 = arith.constant 0 : i32
    %7 = arith.cmpi ne, %6, %c0_i32_3 : i32
    scf.if %7 {
      %cst = arith.constant 0.000000e+00 : f32
      %14 = vector.broadcast %cst : f32 to vector<8x4x128xf32>
      %c0 = arith.constant 0 : index
      %c0_7 = arith.constant 0 : index
      %c0_8 = arith.constant 0 : index
      %15 = vector.load %arg8[%c0, %c0_7, %c0_8] : memref<8x4x128xf32, #tpu.memory_space<vmem>>, vector<8x4x128xf32>
      tpu.vector_store %arg8[%c0, %c0_7, %c0_8], %14 {strides = array<i32>} : memref<8x4x128xf32, #tpu.memory_space<vmem>>, vector<8x4x128xf32>,
    } else {
    }
    %8 = arith.cmpi sge, %arg2, %arg1 : i32
    %9 = arith.extui %8 : i1 to i32
    %c0_i32_4 = arith.constant 0 : i32
    %10 = arith.cmpi ne, %9, %c0_i32_4 : i32
    scf.if %10 {
      %c0 = arith.constant 0 : index
      %c0_7 = arith.constant 0 : index
      %c0_8 = arith.constant 0 : index
      %14 = vector.load %arg8[%c0, %c0_7, %c0_8] : memref<8x4x128xf32, #tpu.memory_space<vmem>>, vector<8x4x128xf32>
      %c0_9 = arith.constant 0 : index
      %c0_10 = arith.constant 0 : index
      %c0_11 = arith.constant 0 : index
      %15 = vector.load %arg3[%c0_9, %c0_10, %c0_11] : memref<8x4x8xf32, #tpu.memory_space<vmem>>, vector<8x4x8xf32>
      %c0_12 = arith.constant 0 : index
      %c0_13 = arith.constant 0 : index
      %c0_14 = arith.constant 0 : index
      %16 = vector.load %arg4[%c0_12, %c0_13, %c0_14] : memref<8x8x128xf32, #tpu.memory_space<vmem>>, vector<8x8x128xf32>
      "tpu.trace_start"() <{level = 10 : i32, message = "mnl,mlk->mnk"}> : () -> ()
      %cst = arith.constant dense<0.000000e+00> : vector<8x4x128xf32>
      %17 = tpu.matmul %15, %16, %cst {dimension_numbers = #tpu.dot_dimension_numbers<[2], [1], [1], [2], [0, 0, 0, 1, 1, 2], [0], [0]>} : vector<8x4x8xf32>, vector<8x8x128xf32>, vector<8x4x128xf32> -> vector<8x4x128xf32>
      "tpu.trace_stop"() : () -> ()
      %18 = arith.addf %14, %17 : vector<8x4x128xf32>
      %c0_15 = arith.constant 0 : index
      %c0_16 = arith.constant 0 : index
      %c0_17 = arith.constant 0 : index
      %19 = vector.load %arg8[%c0_15, %c0_16, %c0_17] : memref<8x4x128xf32, #tpu.memory_space<vmem>>, vector<8x4x128xf32>
      tpu.vector_store %arg8[%c0_15, %c0_16, %c0_17], %18 {strides = array<i32>} : memref<8x4x128xf32, #tpu.memory_space<vmem>>, vector<8x4x128xf32>,
    } else {
    }
    %c0_i32_5 = arith.constant 0 : i32
    %11 = arith.cmpi eq, %arg2, %c0_i32_5 : i32
    %12 = arith.extui %11 : i1 to i32
    %c0_i32_6 = arith.constant 0 : i32
    %13 = arith.cmpi ne, %12, %c0_i32_6 : i32
    scf.if %13 {
      %c0 = arith.constant 0 : index
      %c0_7 = arith.constant 0 : index
      %14 = vector.load %arg5[%c0, %c0_7] : memref<16x8xf32, #tpu.memory_space<vmem>>, vector<16x8xf32>
      %c0_8 = arith.constant 0 : index
      %c0_9 = arith.constant 0 : index
      %15 = vector.load %arg6[%c0_8, %c0_9] : memref<16x8xf32, #tpu.memory_space<vmem>>, vector<16x8xf32>
      %c0_10 = arith.constant 0 : index
      %c0_11 = arith.constant 0 : index
      %c0_12 = arith.constant 0 : index
      %16 = vector.load %arg8[%c0_10, %c0_11, %c0_12] : memref<8x4x128xf32, #tpu.memory_space<vmem>>, vector<8x4x128xf32>
      %c0_13 = arith.constant 0 : index
      %c0_14 = arith.constant 0 : index
      %c0_15 = arith.constant 0 : index
      %17 = vector.load %arg7[%c0_13, %c0_14, %c0_15] : memref<2x16x128xf32, #tpu.memory_space<vmem>>, vector<1x16x128xf32>
      %18 = vector.shape_cast %17 : vector<1x16x128xf32> to vector<16x128xf32>
      %19 = vector.extract_strided_slice %16 {offsets = [0, 0, 0], sizes = [8, 1, 128], strides = [1, 1, 1]} : vector<8x4x128xf32> to vector<8x1x128xf32>
      %20 = vector.shape_cast %19 : vector<8x1x128xf32> to vector<8x128xf32>
      %cst = arith.constant dense<0.000000e+00> : vector<16x128xf32>
      %21 = tpu.matmul %14, %20, %cst {dimension_numbers = #tpu.dot_dimension_numbers<[1], [0], [0], [1], [0, 0, 1, 1], [], []>} : vector<16x8xf32>, vector<8x128xf32>, vector<16x128xf32> -> vector<16x128xf32>
      %22 = arith.addf %18, %21 : vector<16x128xf32>
      %23 = vector.extract_strided_slice %16 {offsets = [0, 2, 0], sizes = [8, 1, 128], strides = [1, 1, 1]} : vector<8x4x128xf32> to vector<8x1x128xf32>
      %24 = vector.shape_cast %23 : vector<8x1x128xf32> to vector<8x128xf32>
      %cst_16 = arith.constant dense<0.000000e+00> : vector<16x128xf32>
      %25 = tpu.matmul %15, %24, %cst_16 {dimension_numbers = #tpu.dot_dimension_numbers<[1], [0], [0], [1], [0, 0, 1, 1], [], []>} : vector<16x8xf32>, vector<8x128xf32>, vector<16x128xf32> -> vector<16x128xf32>
      %26 = arith.addf %22, %25 : vector<16x128xf32>
      %c0_17 = arith.constant 0 : index
      %c0_18 = arith.constant 0 : index
      %c0_19 = arith.constant 0 : index
      %27 = vector.load %arg7[%c0_17, %c0_18, %c0_19] : memref<2x16x128xf32, #tpu.memory_space<vmem>>, vector<1x16x128xf32>
      %28 = vector.shape_cast %27 : vector<1x16x128xf32> to vector<16x128xf32>
      %29 = vector.shape_cast %26 : vector<16x128xf32> to vector<1x16x128xf32>
      tpu.vector_store %arg7[%c0_17, %c0_18, %c0_19], %29 {strides = array<i32>} : memref<2x16x128xf32, #tpu.memory_space<vmem>>, vector<1x16x128xf32>,
      %c1 = arith.constant 1 : index
      %c0_20 = arith.constant 0 : index
      %c0_21 = arith.constant 0 : index
      %30 = vector.load %arg7[%c1, %c0_20, %c0_21] : memref<2x16x128xf32, #tpu.memory_space<vmem>>, vector<1x16x128xf32>
      %31 = vector.shape_cast %30 : vector<1x16x128xf32> to vector<16x128xf32>
      %32 = vector.extract_strided_slice %16 {offsets = [0, 1, 0], sizes = [8, 1, 128], strides = [1, 1, 1]} : vector<8x4x128xf32> to vector<8x1x128xf32>
      %33 = vector.shape_cast %32 : vector<8x1x128xf32> to vector<8x128xf32>
      %cst_22 = arith.constant dense<0.000000e+00> : vector<16x128xf32>
      %34 = tpu.matmul %14, %33, %cst_22 {dimension_numbers = #tpu.dot_dimension_numbers<[1], [0], [0], [1], [0, 0, 1, 1], [], []>} : vector<16x8xf32>, vector<8x128xf32>, vector<16x128xf32> -> vector<16x128xf32>
      %35 = arith.addf %31, %34 : vector<16x128xf32>
      %36 = vector.extract_strided_slice %16 {offsets = [0, 3, 0], sizes = [8, 1, 128], strides = [1, 1, 1]} : vector<8x4x128xf32> to vector<8x1x128xf32>
      %37 = vector.shape_cast %36 : vector<8x1x128xf32> to vector<8x128xf32>
      %cst_23 = arith.constant dense<0.000000e+00> : vector<16x128xf32>
      %38 = tpu.matmul %15, %37, %cst_23 {dimension_numbers = #tpu.dot_dimension_numbers<[1], [0], [0], [1], [0, 0, 1, 1], [], []>} : vector<16x8xf32>, vector<8x128xf32>, vector<16x128xf32> -> vector<16x128xf32>
      %39 = arith.addf %35, %38 : vector<16x128xf32>
      %c1_24 = arith.constant 1 : index
      %c0_25 = arith.constant 0 : index
      %c0_26 = arith.constant 0 : index
      %40 = vector.load %arg7[%c1_24, %c0_25, %c0_26] : memref<2x16x128xf32, #tpu.memory_space<vmem>>, vector<1x16x128xf32>
      %41 = vector.shape_cast %40 : vector<1x16x128xf32> to vector<16x128xf32>
      %42 = vector.shape_cast %39 : vector<16x128xf32> to vector<1x16x128xf32>
      tpu.vector_store %arg7[%c1_24, %c0_25, %c0_26], %42 {strides = array<i32>} : memref<2x16x128xf32, #tpu.memory_space<vmem>>, vector<1x16x128xf32>,
    } else {
    }
    return
  }
  func.func @transform_0(%arg0: i32, %arg1: i32, %arg2: i32) -> (i32, i32, i32) {
    %0 = arith.maxsi %arg2, %arg1 : i32
    %c0_i32 = arith.constant 0 : i32
    %c0_i32_0 = arith.constant 0 : i32
    return %arg1, %c0_i32, %0 : i32, i32, i32
  }
  func.func @transform_1(%arg0: i32, %arg1: i32, %arg2: i32) -> (i32, i32, i32) {
    %0 = arith.maxsi %arg2, %arg1 : i32
    %c0_i32 = arith.constant 0 : i32
    return %arg1, %0, %arg0 : i32, i32, i32
  }
  func.func @transform_2(%arg0: i32, %arg1: i32, %arg2: i32) -> (i32, i32) {
    %c0_i32 = arith.constant 0 : i32
    %c0_i32_0 = arith.constant 0 : i32
    return %c0_i32, %arg1 : i32, i32
  }
  func.func @transform_3(%arg0: i32, %arg1: i32, %arg2: i32) -> (i32, i32) {
    %c0_i32 = arith.constant 0 : i32
    %c0_i32_0 = arith.constant 0 : i32
    return %c0_i32, %arg1 : i32, i32
  }
  func.func @transform_4(%arg0: i32, %arg1: i32, %arg2: i32) -> (i32, i32, i32) {
    %c0_i32 = arith.constant 0 : i32
    %c0_i32_0 = arith.constant 0 : i32
    %c0_i32_1 = arith.constant 0 : i32
    return %c0_i32, %c0_i32_0, %arg0 : i32, i32, i32
  }
}

</mosaic_0001>

<bundles_post_ra>
// kernel: _grf_isht_forward.1
= control target key start
LH: loop header
LB: loop body
LE: loop exit
PB: predicated region body
PF: predicated region fallthrough
CT: control target
= control target key end

     0   :  { %v1201_v0 = vmov 0.0   ;;  %vm66_vm0 = vcmask 64512   ;;  %vm1202_vm1 = vmmov 0   ;;  %vm693_vm2 = vcmask 1041409   ;;  %s1360_s1 = inlined_call_operand.vmem [shape: f32[8,8,128], index: 1, kind: input, shape index: {}]   ;;  %s1361_s0 = inlined_call_operand.vmem [shape: f32[8,4,8], index: 0, kind: input, shape index: {}]   ;;  %s1362_s2 = inlined_call_operand.vmem [shape: f32[16,8], index: 2, kind: input, shape index: {}]   ;;  %s1363_s3 = inlined_call_operand.vmem [shape: f32[16,8], index: 3, kind: input, shape index: {}]   ;;  %s1364_s4 = inlined_call_operand.vmem [shape: f32[2,16,128], index: 4, kind: output, shape index: {}]  }
   0x1   :  { %1139 = vmatprep.subr.mxu0 %v1201_v0  ;;  %30 = vst [vmem:[#allocation2] sm:$0xf] %v1201_v0  ;;  %31 = vst [vmem:[#allocation2 + $0x4] sm:$0xf] %v1201_v0  ;;  %1144 = vmatprep.subr.mxu1 %v1201_v0  ;;  %v58_v1 = vld [vmem:[%s1360_s1] sm:$0xff]  ;;  %v59_v2 = vld [vmem:[%s1360_s1 + $0x8] sm:$0xff] }
   0x2   :  { %32 = vst [vmem:[#allocation2 + $0x8] sm:$0xf] %v1201_v0  ;;  %33 = vst [vmem:[#allocation2 + $0xc] sm:$0xf] %v1201_v0  ;;  %v50_v3 = vld [vmem:[%s1361_s0] sm:$0xf]  ;;  %1140 = vmatpush3.msra.mxu0 %v58_v1  ;;  %1141 = vmatprep.mubr.msk.f32.mxu0 %vm1202_vm1, %v1201_v0 }
   0x3   :  { %34 = vst [vmem:[#allocation2 + $0x10] sm:$0xf] %v1201_v0  ;;  %35 = vst [vmem:[#allocation2 + $0x14] sm:$0xf] %v1201_v0  ;;  %v51_v4 = vld [vmem:[%s1361_s0 + $0x4] sm:$0xf]  ;;  %1145 = vmatpush3.msra.mxu1 %v59_v2  ;;  %1146 = vmatprep.mubr.msk.f32.mxu1 %vm1202_vm1, %v1201_v0 }
   0x4   :  { %36 = vst [vmem:[#allocation2 + $0x18] sm:$0xf] %v1201_v0  ;;  %37 = vst [vmem:[#allocation2 + $0x1c] sm:$0xf] %v1201_v0  ;;  %v60_v5 = vld [vmem:[%s1360_s1 + $0x10] sm:$0xff]  ;;  %1142 = vmatmul.mubr.msk.f32.vlgmr.msra.gmra.mxu0 %vm66_vm0, %v50_v3  ;;  %1147 = vmatmul.mubr.msk.f32.vlgmr.msra.gmra.mxu1 %vm66_vm0, %v51_v4  ;;  %v61_v6 = vld [vmem:[%s1360_s1 + $0x18] sm:$0xff] }
   0x5   :  { %1149 = vmatprep.subr.mxu0 %v1201_v0  ;;  %1154 = vmatprep.subr.mxu1 %v1201_v0  ;;  %v52_v7 = vld [vmem:[%s1361_s0 + $0x8] sm:$0xf]  ;;  %v53_v8 = vld [vmem:[%s1361_s0 + $0xc] sm:$0xf]  ;;  %v62_v9 = vld [vmem:[%s1360_s1 + $0x20] sm:$0xff]  ;;  %vm696_vm3 = vcmask 1042434  }
   0x6   :  { %1150 = vmatpush3.msra.mxu0 %v60_v5  ;;  %1151 = vmatprep.mubr.msk.f32.mxu0 %vm1202_vm1, %v1201_v0  ;;  %v63_v10 = vld [vmem:[%s1360_s1 + $0x28] sm:$0xff]  ;;  %v54_v11 = vld [vmem:[%s1361_s0 + $0x10] sm:$0xf]  ;;  %v55_v12 = vld [vmem:[%s1361_s0 + $0x14] sm:$0xf]  ;;  %vm699_vm4 = vcmask 1043459  }
   0x7   :  { %1155 = vmatpush3.msra.mxu1 %v61_v6  ;;  %1156 = vmatprep.mubr.msk.f32.mxu1 %vm1202_vm1, %v1201_v0  ;;  %v64_v13 = vld [vmem:[%s1360_s1 + $0x30] sm:$0xff]  ;;  %v65_v14 = vld [vmem:[%s1360_s1 + $0x38] sm:$0xff]  ;;  %v1295_v17 = vld [vmem:[%s1362_s2] sm:$0xff]  ;;  %vm702_vm5 = vcmask 1044484   ;;  %vm705_vm6 = vcmask 1045509   ;;  %vm708_vm7 = vcmask 1046534  }
   0x8   :  { %1152 = vmatmul.mubr.msk.f32.vlgmr.msra.gmra.mxu0 %vm66_vm0, %v52_v7  ;;  %1157 = vmatmul.mubr.msk.f32.vlgmr.msra.gmra.mxu1 %vm66_vm0, %v53_v8  ;;  %v56_v15 = vld [vmem:[%s1361_s0 + $0x18] sm:$0xf]  ;;  %v57_v16 = vld [vmem:[%s1361_s0 + $0x1c] sm:$0xf]  ;;  %v1300_v18 = vld [vmem:[%s1363_s3] sm:$0xff]  ;;  %vm711_vm8 = vcmask 1047559  }
   0x9   :  { %1159 = vmatprep.subr.mxu0 %v1201_v0  ;;  %1164 = vmatprep.subr.mxu1 %v1201_v0  ;;  %v42_v19 = vld [vmem:[#allocation2] sm:$0xf]  ;;  %v43_v20 = vld [vmem:[#allocation2 + $0x4] sm:$0xf]  ;;  %v44_v27 = vld [vmem:[#allocation2 + $0x8] sm:$0xf] }
   0xa   :  { %1160 = vmatpush3.msra.mxu0 %v62_v9  ;;  %1161 = vmatprep.mubr.msk.f32.mxu0 %vm1202_vm1, %v1201_v0  ;;  %v45_v28 = vld [vmem:[#allocation2 + $0xc] sm:$0xf]  ;;  %v46_v35 = vld [vmem:[#allocation2 + $0x10] sm:$0xf]  ;;  %v47_v36 = vld [vmem:[#allocation2 + $0x14] sm:$0xf] }
   0xb   :  { %1165 = vmatpush3.msra.mxu1 %v63_v10  ;;  %1166 = vmatprep.mubr.msk.f32.mxu1 %vm1202_vm1, %v1201_v0  ;;  %v48_v41 = vld [vmem:[#allocation2 + $0x18] sm:$0xf]  ;;  %v49_v44 = vld [vmem:[#allocation2 + $0x1c] sm:$0xf] }
   0xc   :  { %1162 = vmatmul.mubr.msk.f32.vlgmr.msra.gmra.mxu0 %vm66_vm0, %v54_v11  ;;  %1167 = vmatmul.mubr.msk.f32.vlgmr.msra.gmra.mxu1 %vm66_vm0, %v55_v12 }
   0xd   :  { %1169 = vmatprep.subr.mxu0 %v1201_v0  ;;  %1174 = vmatprep.subr.mxu1 %v1201_v0 }
   0xe   :  { %1170 = vmatpush3.msra.mxu0 %v64_v13  ;;  %1171 = vmatprep.mubr.msk.f32.mxu0 %vm1202_vm1, %v1201_v0 }
   0xf   :  { %1175 = vmatpush3.msra.mxu1 %v65_v14  ;;  %1176 = vmatprep.mubr.msk.f32.mxu1 %vm1202_vm1, %v1201_v0 }
  0x10   :  { %1172 = vmatmul.mubr.msk.f32.vlgmr.msra.gmra.mxu0 %vm66_vm0, %v56_v15  ;;  %1177 = vmatmul.mubr.msk.f32.vlgmr.msra.gmra.mxu1 %vm66_vm0, %v57_v16 }
  0x11   :  { %1181 = vmatprep.mubr.msk.f32.mxu0 %vm66_vm0, %v1295_v17  ;;  %1186 = vmatprep.mubr.msk.f32.mxu1 %vm66_vm0, %v1300_v18 }
  0xc4   :  { %v136_v21 = vpop.f32.mrf.mxu0  ;;  %v209_v22 = vpop.f32.mrf.mxu1 }
  0xc5   :  { %v651_v23 = vadd.f32 %v136_v21, %v42_v19  ;;  %v652_v24 = vadd.f32 %v209_v22, %v43_v20 }
  0xc6   :  { %v1143_v25 = vpop.f32.mrf.mxu0  ;;  %v1148_v26 = vpop.f32.mrf.mxu1 }
  0xc7   :  { %659 = vst [vmem:[#allocation2] sm:$0xf] %v651_v23  ;;  %660 = vst [vmem:[#allocation2 + $0x4] sm:$0xf] %v652_v24 }
  0xc8   :  { %v282_v29 = vpop.f32.mrf.mxu0  ;;  %v355_v30 = vpop.f32.mrf.mxu1 }
  0xc9   :  { %v653_v31 = vadd.f32 %v282_v29, %v44_v27  ;;  %v654_v32 = vadd.f32 %v355_v30, %v45_v28 }
  0xca   :  { %v1153_v33 = vpop.f32.mrf.mxu0  ;;  %v1158_v34 = vpop.f32.mrf.mxu1 }
  0xcb   :  { %661 = vst [vmem:[#allocation2 + $0x8] sm:$0xf] %v653_v31  ;;  %662 = vst [vmem:[#allocation2 + $0xc] sm:$0xf] %v654_v32 }
  0xcc   :  { %v428_v37 = vpop.f32.mrf.mxu0  ;;  %v501_v38 = vpop.f32.mrf.mxu1 }
  0xcd   :  { %v655_v39 = vadd.f32 %v428_v37, %v46_v35  ;;  %v656_v40 = vadd.f32 %v501_v38, %v47_v36 }
  0xce   :  { %v1163_v42 = vpop.f32.mrf.mxu0  ;;  %v1168_v43 = vpop.f32.mrf.mxu1  ;;  %v674_v45 = vld [vmem:[#allocation2] sm:$0xf]  ;;  %v675_v46 = vld [vmem:[#allocation2 + $0x4] sm:$0xf] }
  0xcf   :  { %663 = vst [vmem:[#allocation2 + $0x10] sm:$0xf] %v655_v39  ;;  %664 = vst [vmem:[#allocation2 + $0x14] sm:$0xf] %v656_v40  ;;  %v692_v47 = vrot.slane %v675_v46, 7  ;;  %v798_v48 = vrot.slane %v674_v45, 2 }
  0xd0   :  { %v799_v49 = vrot.slane %v675_v46, 1  ;;  %v574_v50 = vpop.f32.mrf.mxu0  ;;  %v647_v51 = vpop.f32.mrf.mxu1  ;;  %v901_v52 = vrot.slane %v674_v45, 1  ;;  %v993_v53 = vrot.slane %v674_v45, 3  ;;  %v994_v57 = vrot.slane %v675_v46, 2 }
  0xd1   :  { %v657_v54 = vadd.f32 %v574_v50, %v48_v41  ;;  %v658_v55 = vadd.f32 %v647_v51, %v49_v44  ;;  %v694_v62 = vsel %vm693_vm2, %v692_v47, %v674_v45  ;;  %v671_v50 = vld [vmem:[%s1362_s2 + $0x8] sm:$0xff] }
  0xd2   :  { %v800_v56 = vsel %vm693_vm2, %v799_v49, %v798_v48  ;;  %v1173_v58 = vpop.f32.mrf.mxu0  ;;  %v1178_v59 = vpop.f32.mrf.mxu1  ;;  %v676_v60 = vld [vmem:[#allocation2 + $0x8] sm:$0xf]  ;;  %v677_v61 = vld [vmem:[#allocation2 + $0xc] sm:$0xf]  ;;  %v902_v7 = vsel %vm693_vm2, %v675_v46, %v901_v52  ;;  %v995_v8 = vsel %vm693_vm2, %v994_v57, %v993_v53 }
  0xd3   :  { %665 = vst [vmem:[#allocation2 + $0x18] sm:$0xf] %v657_v54  ;;  %666 = vst [vmem:[#allocation2 + $0x1c] sm:$0xf] %v658_v55  ;;  %v695_v63 = vrot.slane %v676_v60, 6  ;;  %v801_v0 = vsel %vm696_vm3, %v676_v60, %v800_v56  ;;  %v802_v1 = vrot.slane %v677_v61, 7 }
  0xd4   :  { %v698_v2 = vrot.slane %v677_v61, 5  ;;  %v903_v3 = vrot.slane %v676_v60, 7  ;;  %v905_v4 = vrot.slane %v677_v61, 6  ;;  %v996_v5 = vrot.slane %v676_v60, 1  ;;  %v673_v51 = vld [vmem:[%s1363_s3 + $0x8] sm:$0xff] }
  0xd5   :  { %v697_v6 = vsel %vm696_vm3, %v695_v63, %v694_v62  ;;  %v803_v11 = vsel %vm699_vm4, %v802_v1, %v801_v0 }
  0xd6   :  { %v678_v9 = vld [vmem:[#allocation2 + $0x10] sm:$0xf]  ;;  %v679_v10 = vld [vmem:[#allocation2 + $0x14] sm:$0xf]  ;;  %v904_v12 = vsel %vm696_vm3, %v903_v3, %v902_v7  ;;  %v997_v13 = vsel %vm696_vm3, %v996_v5, %v995_v8  ;;  %v700_v20 = vsel %vm699_vm4, %v698_v2, %v697_v6 }
  0xd7   :  { %v701_v14 = vrot.slane %v678_v9, 4  ;;  %v704_v15 = vrot.slane %v679_v10, 3  ;;  %v804_v16 = vrot.slane %v678_v9, 6  ;;  %v806_v19 = vrot.slane %v679_v10, 5 }
  0xd8   :  { %v906_v21 = vsel %vm699_vm4, %v905_v4, %v904_v12  ;;  %v907_v22 = vrot.slane %v678_v9, 5  ;;  %v909_v23 = vrot.slane %v679_v10, 4  ;;  %v999_v26 = vrot.slane %v678_v9, 7 }
  0xd9   :  { %v703_v24 = vsel %vm702_vm5, %v701_v14, %v700_v20  ;;  %v805_v25 = vsel %vm702_vm5, %v804_v16, %v803_v11  ;;  %v1001_v27 = vrot.slane %v679_v10, 6  ;;  %v998_v33 = vsel %vm699_vm4, %v677_v61, %v997_v13 }
  0xda   :  { %v680_v28 = vld [vmem:[#allocation2 + $0x18] sm:$0xf]  ;;  %v681_v29 = vld [vmem:[#allocation2 + $0x1c] sm:$0xf]  ;;  %v706_v30 = vsel %vm705_vm6, %v704_v15, %v703_v24  ;;  %v807_v31 = vsel %vm705_vm6, %v806_v19, %v805_v25  ;;  %v908_v32 = vsel %vm702_vm5, %v907_v22, %v906_v21  ;;  %v1000_v41 = vsel %vm702_vm5, %v999_v26, %v998_v33 }
  0xdb   :  { %v707_v34 = vrot.slane %v680_v28, 2  ;;  %v710_v35 = vrot.slane %v681_v29, 1  ;;  %v808_v36 = vrot.slane %v680_v28, 4  ;;  %v810_v37 = vrot.slane %v681_v29, 3 }
  0xdc   :  { %v910_v38 = vsel %vm705_vm6, %v909_v23, %v908_v32  ;;  %v911_v39 = vrot.slane %v680_v28, 3  ;;  %v913_v40 = vrot.slane %v681_v29, 2  ;;  %v1002_v44 = vsel %vm705_vm6, %v1001_v27, %v1000_v41 }
  0xdd   :  { %v709_v42 = vsel %vm708_vm7, %v707_v34, %v706_v30  ;;  %v809_v43 = vsel %vm708_vm7, %v808_v36, %v807_v31  ;;  %v1003_v45 = vrot.slane %v680_v28, 5  ;;  %v1005_v49 = vrot.slane %v681_v29, 4 }
  0xde   :  { %v712_v46 = vsel %vm711_vm8, %v710_v35, %v709_v42  ;;  %v811_v47 = vsel %vm711_vm8, %v810_v37, %v809_v43  ;;  %v912_v48 = vsel %vm708_vm7, %v911_v39, %v910_v38 }
  0xdf   :  { %1179 = vmatprep.subr.mxu0 %v712_v46  ;;  %1184 = vmatprep.subr.mxu1 %v811_v47  ;;  %v1004_v52 = vsel %vm708_vm7, %v1003_v45, %v1002_v44  ;;  %v914_v53 = vsel %vm711_vm8, %v913_v40, %v912_v48 }
  0xe0   :  { %1180 = vmatpush3.msra.mxu0 %v712_v46  ;;  %1185 = vmatpush3.msra.mxu1 %v811_v47  ;;  %v1006_v54 = vsel %vm711_vm8, %v1005_v49, %v1004_v52 }
  0xe1   :  { %1189 = vmatprep.subr.mxu0 %v914_v53  ;;  %1194 = vmatprep.subr.mxu1 %v1006_v54 }
  0xe2   :  { %1182 = vmatmul.mubr.msk.f32.vlgmr.msra.gmra.mxu0 %vm66_vm0, %v671_v50  ;;  %1187 = vmatmul.mubr.msk.f32.vlgmr.msra.gmra.mxu1 %vm66_vm0, %v673_v51 }
  0xe3   :  { %1190 = vmatpush3.msra.mxu0 %v914_v53  ;;  %1195 = vmatpush3.msra.mxu1 %v1006_v54 }
  0xe4   :  { %1191 = vmatprep.mubr.msk.f32.mxu0 %vm66_vm0, %v1295_v17  ;;  %1196 = vmatprep.mubr.msk.f32.mxu1 %vm66_vm0, %v1300_v18 }
  0xe6   :  { %1192 = vmatmul.mubr.msk.f32.vlgmr.msra.gmra.mxu0 %vm66_vm0, %v671_v50  ;;  %1197 = vmatmul.mubr.msk.f32.vlgmr.msra.gmra.mxu1 %vm66_vm0, %v673_v51 }
 0x1a2   :  { %v1183_v55 = vpop.f32.mrf.mxu0  ;;  %v1188_v56 = vpop.f32.mrf.mxu1 }
 0x1a3   :  { %v895_v59 = vadd.f32 %v1188_v56, %v1183_v55 }
 0x1a4   :  { %v787_v57 = vpop.f32.mrf.mxu0  ;;  %v885_v58 = vpop.f32.mrf.mxu1 }
 0x1a5   :  { %897 = vst [vmem:[%s1364_s4 + $0x8] sm:$0xff] %v895_v59  ;;  %v894_v62 = vadd.f32 %v885_v58, %v787_v57 }
 0x1a6   :  { %v1193_v60 = vpop.f32.mrf.mxu0  ;;  %v1198_v61 = vpop.f32.mrf.mxu1 }
 0x1a7   :  { %896 = vst [vmem:[%s1364_s4] sm:$0xff] %v894_v62  ;;  %v1084_v18 = vadd.f32 %v1198_v61, %v1193_v60 }
 0x1a8   :  { %v982_v17 = vpop.f32.mrf.mxu0  ;;  %v1074_v63 = vpop.f32.mrf.mxu1 }
 0x1a9   :  { %1110 = vst [vmem:[%s1364_s4 + $0x18] sm:$0xff] %v1084_v18  ;;  %v1083_v0 = vadd.f32 %v1074_v63, %v982_v17 }
 0x1ab   :  { %1109 = vst [vmem:[%s1364_s4 + $0x10] sm:$0xff] %v1083_v0 }

</bundles_post_ra>
